<compile_context>
chip_gen: v6e
topology: v6e:2x2x1
jax: 0.10.0
libtpu: 0.0.40
codegen_flags: <defaults>
</compile_context>

<pallas_src>
import functools
import math

import jax
import jax.numpy as jnp
from jax.experimental import pallas as pl
from jax.experimental.pallas import tpu as pltpu


def _conv_kernel(p_ref, w_ref, o_ref, *, negative_slope: float):
    # p_ref: (K, TM) patch slab (K = 9*Cin + 1, last row is the bias "ones" row)
    # w_ref: (Cout, K) weight matrix with bias folded into the last column
    # o_ref: (Cout, TM)
    p = p_ref[...]
    a = jnp.where(p >= 0, p, p * negative_slope)          # LeakyReLU (LeakyReLU(1)=1 keeps bias row intact)
    o_ref[...] = jnp.dot(
        w_ref[...], a, preferred_element_type=jnp.float32
    ).astype(o_ref.dtype)


def conv_forward(x: jax.Array, w: jax.Array, b: jax.Array,
                 negative_slope: float = 0.2) -> jax.Array:
    """Forward of `Conv`: LeakyReLU(negative_slope) then Conv2d(3x3, stride=2, pad=1)."""
    N, Cin, H, W = x.shape
    Cout, Cin_w, KH, KW = w.shape
    assert Cin == Cin_w and (KH, KW) == (3, 3)
    stride, pad = 2, 1
    Ho = (H + 2 * pad - KH) // stride + 1
    Wo = (W + 2 * pad - KW) // stride + 1
    M = N * Ho * Wo

    # ---- wrapper-side layout plumbing (zero pad + strided im2col) ----------
    # Zero padding commutes with LeakyReLU, so padding before the in-kernel
    # activation is exact.
    xp = jnp.pad(x, ((0, 0), (0, 0), (pad, pad), (pad, pad)))
    cols = []
    for dy in range(KH):
        for dx in range(KW):
            s = xp[:, :, dy:dy + stride * Ho:stride, dx:dx + stride * Wo:stride]  # (N,Cin,Ho,Wo)
            cols.append(jnp.transpose(s, (1, 0, 2, 3)).reshape(Cin, M))
    patches = jnp.concatenate(cols, axis=0)                                       # (9*Cin, M)

    # Fold the bias into the matmul: ones-row in the patches, bias column in W.
    w2 = jnp.transpose(w, (0, 2, 3, 1)).reshape(Cout, KH * KW * Cin)
    w_aug = jnp.concatenate([w2, b.reshape(Cout, 1)], axis=1).astype(x.dtype)     # (Cout, K)
    K = KH * KW * Cin + 1
    p_aug = jnp.concatenate([patches, jnp.ones((1, M), x.dtype)], axis=0)         # (K, M)

    # Pad the lane axis to a multiple of 128 -> lane-dense tiles, unmasked vst.
    Mp = ((M + 127) // 128) * 128
    if Mp != M:
        p_aug = jnp.pad(p_aug, ((0, 0), (0, Mp - M)))

    # Tile M; TM is a multiple of 128 that divides Mp (<= 1024 keeps VMEM tiny
    # even for large Cin on v7x's smaller VMEM).
    TM = math.gcd(Mp, 1024)
    grid = (Mp // TM,)

    kernel = functools.partial(_conv_kernel, negative_slope=negative_slope)
    out2 = pl.pallas_call(
        kernel,
        out_shape=jax.ShapeDtypeStruct((Cout, Mp), x.dtype),
        grid_spec=pltpu.PrefetchScalarGridSpec(
            num_scalar_prefetch=0,
            grid=grid,
            in_specs=[
                pl.BlockSpec((K, TM), lambda m: (0, m)),       # patch slab tile
                pl.BlockSpec((Cout, K), lambda m: (0, 0)),     # weights, resident
            ],
            out_specs=pl.BlockSpec((Cout, TM), lambda m: (0, m)),
        ),
        compiler_params=pltpu.CompilerParams(
            dimension_semantics=("parallel",),
        ),
    )(p_aug, w_aug)

    out = out2[:, :M].reshape(Cout, N, Ho, Wo)
    return jnp.transpose(out, (1, 0, 2, 3))                   # NCHW


def _reference(x: jax.Array, w: jax.Array, b: jax.Array,
               negative_slope: float = 0.2) -> jax.Array:
    """Pure-JAX reference: LeakyReLU then strided conv (matches PyTorch)."""
    a = jnp.where(x >= 0, x, negative_slope * x)
    y = jax.lax.conv_general_dilated(
        a, w, window_strides=(2, 2), padding=((1, 1), (1, 1)),
        dimension_numbers=("NCHW", "OIHW", "NCHW"))
    return y + b[None, :, None, None]


if __name__ == "__main__":
    key = jax.random.PRNGKey(0)
    k1, k2, k3 = jax.random.split(key, 3)
    N, Cin, Cout, H, W = 2, 4, 8, 16, 16
    x = jax.random.normal(k1, (N, Cin, H, W), dtype=jnp.float32)
    w = jax.random.normal(k2, (Cout, Cin, 3, 3), dtype=jnp.float32) * 0.1
    b = jax.random.normal(k3, (Cout,), dtype=jnp.float32) * 0.1

    y = conv_forward(x, w, b)
    y = jax.block_until_ready(y)

    y_ref = _reference(x, w, b)
    assert y.shape == (N, Cout, H // 2, W // 2), y.shape
    assert jnp.allclose(y, y_ref, atol=1e-4, rtol=1e-4), float(jnp.max(jnp.abs(y - y_ref)))

    print("KERNEL_OK")
</pallas_src>

<mosaic_0001>
module attributes {stable_mosaic.version = 11 : i64} {
  func.func @_conv_kernel(%arg0: i32, %arg1: memref<37x128xf32, #tpu.memory_space<vmem>>, %arg2: memref<8x37xf32, #tpu.memory_space<vmem>>, %arg3: memref<8x128xf32, #tpu.memory_space<vmem>>) attributes {dimension_semantics = [#tpu.dimension_semantics<parallel>], iteration_bounds = array<i64: 1>, scalar_prefetch = 0 : i64, scratch_operands = 0 : i64, tpu.core_type = #tpu.core_type<tc>, window_params = [{transform_indices = @transform_0, window_bounds = array<i64: 37, 128>}, {pipeline_mode = #tpu.pipeline_mode<synchronous>, transform_indices = @transform_1, window_bounds = array<i64: 8, 37>}, {transform_indices = @transform_2, window_bounds = array<i64: 8, 128>}]} {
    %c0 = arith.constant 0 : index
    %c0_0 = arith.constant 0 : index
    %0 = vector.load %arg1[%c0, %c0_0] : memref<37x128xf32, #tpu.memory_space<vmem>>, vector<37x128xf32>
    %cst = arith.constant 0.000000e+00 : f32
    %1 = vector.broadcast %cst : f32 to vector<37x128xf32>
    %2 = arith.cmpf oge, %0, %1 : vector<37x128xf32>
    %cst_1 = arith.constant 2.000000e-01 : f32
    %3 = vector.broadcast %cst_1 : f32 to vector<37x128xf32>
    %4 = arith.mulf %0, %3 : vector<37x128xf32>
    %5 = arith.select %2, %0, %4 : vector<37x128xi1>, vector<37x128xf32>
    %c0_2 = arith.constant 0 : index
    %c0_3 = arith.constant 0 : index
    %6 = vector.load %arg2[%c0_2, %c0_3] : memref<8x37xf32, #tpu.memory_space<vmem>>, vector<8x37xf32>
    %cst_4 = arith.constant dense<0.000000e+00> : vector<8x128xf32>
    %7 = tpu.matmul %6, %5, %cst_4 {dimension_numbers = #tpu.dot_dimension_numbers<[1], [0], [0], [1], [0, 0, 1, 1], [], []>} : vector<8x37xf32>, vector<37x128xf32>, vector<8x128xf32> -> vector<8x128xf32>
    %c0_5 = arith.constant 0 : index
    %c0_6 = arith.constant 0 : index
    %8 = vector.load %arg3[%c0_5, %c0_6] : memref<8x128xf32, #tpu.memory_space<vmem>>, vector<8x128xf32>
    tpu.vector_store %arg3[%c0_5, %c0_6], %7 {strides = array<i32>} : memref<8x128xf32, #tpu.memory_space<vmem>>, vector<8x128xf32>,
    return
  }
  func.func @transform_0(%arg0: i32) -> (i32, i32) {
    %c0_i32 = arith.constant 0 : i32
    %c0_i32_0 = arith.constant 0 : i32
    return %c0_i32, %arg0 : i32, i32
  }
  func.func @transform_1(%arg0: i32) -> (i32, i32) {
    %c0_i32 = arith.constant 0 : i32
    %c0_i32_0 = arith.constant 0 : i32
    %c0_i32_1 = arith.constant 0 : i32
    return %c0_i32, %c0_i32_0 : i32, i32
  }
  func.func @transform_2(%arg0: i32) -> (i32, i32) {
    %c0_i32 = arith.constant 0 : i32
    %c0_i32_0 = arith.constant 0 : i32
    return %c0_i32, %arg0 : i32, i32
  }
}

</mosaic_0001>

<bundles_post_ra>
// kernel: tpu_custom_call.1
= control target key start
LH: loop header
LB: loop body
LE: loop exit
PB: predicated region body
PF: predicated region fallthrough
CT: control target
= control target key end

     0   :  { %7 = vsyncpa [#allocation3], 0  ;;  %s279_s0 = inlined_call_operand.hbm [shape: f32[37,128], index: 0, kind: input, shape index: {}]   ;;  %s280_s1 = inlined_call_operand.hbm [shape: f32[8,37], index: 1, kind: input, shape index: {}]   ;;  %s281_s2 = inlined_call_operand.hbm [shape: f32[8,128], index: 2, kind: output, shape index: {}]  }
   0x1   :  { %8 = vsyncpa [#allocation6], 0 }
   0x2   :  { %9 = vsyncpa [#allocation4], 0  ;;  %s248_s9 = smov [#allocation2]  }
   0x3   :  { %s15_s10 = sshll.u32 %s248_s9, 4  ;;  %s16_s10 = int_to_ptr.vmem [resolvable:$true] %s15_s10 }
   0x4   :  { %s190_s11 = scalar_lea.vmem %s16_s10, 640  ;;  %p195_p1 = scmp.lt.s32.totalorder %s16_s10, %s16_s10 }
   0x5   :  { %p191_p0 = scmp.ne.s32.totalorder %s16_s10, %s190_s11  ;;  %p196_p2 = scmp.lt.s32.totalorder %s190_s11, %s190_s11 }
   0x7   :  { %p197_p3 = por %p196_p2, %p195_p1 }
   0x9   :  { %p198_p4 = pnand %p197_p3, %p191_p0 }
   0xb   :  { %201 = shalt.err (!%p198_p4)
}
   0xc   :  { %s249_s12 = smov 128   ;;  %s250_s13 = smov 8  }
   0xd   :  { %21 = dma.hbm_to_vmem [thread:$0]  %s279_s0, 640, %s16_s10, [#allocation3], %s249_s12, %s249_s12, %s250_s13  }
   0xe   :  { %s251_s16 = smov [#allocation5]  }
   0xf   :  { %s28_s17 = sshll.u32 %s251_s16, 4  ;;  %s29_s17 = int_to_ptr.vmem [resolvable:$true] %s28_s17 }
  0x10   :  { %s210_s18 = scalar_lea.vmem %s29_s17, 128  ;;  %p215_p6 = scmp.lt.s32.totalorder %s29_s17, %s29_s17 }
  0x11   :  { %p211_p5 = scmp.ne.s32.totalorder %s29_s17, %s210_s18  ;;  %p216_p7 = scmp.lt.s32.totalorder %s210_s18, %s210_s18 }
  0x13   :  { %p217_p8 = por %p216_p7, %p215_p6 }
  0x15   :  { %p218_p9 = pnand %p217_p8, %p211_p5 }
  0x17   :  { %221 = shalt.err (!%p218_p9)
}
  0x18   :  { %31 = dma.hbm_to_vmem [thread:$0]  %s280_s1, 128, %s29_s17, [#allocation6]  }
  0x19   :  { %242 = dma.done.wait [#allocation3], 640  }
  0x1a   :  { %243 = vsyncadd [#allocation3], 4294966656 }
  0x1b   :  { %244 = dma.done.wait [#allocation6], 128  }
  0x1c   :  { %245 = vsyncadd [#allocation6], 4294967168  ;;  %v252_v0 = vmov 0.0   ;;  %vm253_vm0 = vmmov 0   ;;  %v42_v1 = vld [vmem:[#allocation2 + $0x20] sm:$0x1f] }
  0x1d   :  { %162 = vmatprep.subr.mxu0 %v252_v0  ;;  %172 = vmatprep.mubr.msk.f32.mxu0 %vm253_vm0, %v252_v0  ;;  %vm63_vm1 = vcmask 1044480   ;;  %v41_v2 = vld [vmem:[#allocation2 + $0x18] sm:$0xff]  ;;  %v40_v3 = vld [vmem:[#allocation2 + $0x10] sm:$0xff]  ;;  %vm47_vm2 = vcmp.ge.f32.partialorder %v42_v1, 0.0  ;;  %v52_v4 = vmul.f32 0.2, %v42_v1 }
  0x1e   :  { %vm46_vm3 = vcmp.ge.f32.partialorder %v41_v2, 0.0  ;;  %v51_v5 = vmul.f32 0.2, %v41_v2  ;;  %vm45_vm4 = vcmp.ge.f32.partialorder %v40_v3, 0.0  ;;  %v50_v6 = vmul.f32 0.2, %v40_v3 }
  0x1f   :  { %v39_v7 = vld [vmem:[#allocation2 + $0x8] sm:$0xff]  ;;  %v38_v8 = vld [vmem:[#allocation2] sm:$0xff]  ;;  %v57_v9 = vsel %vm47_vm2, %v42_v1, %v52_v4  ;;  %vm59_vm7 = vcmask 302080   ;;  %s254_s0 = smov [#allocation7]  }
  0x20   :  { %v56_v10 = vsel %vm46_vm3, %v41_v2, %v51_v5  ;;  %v49_v11 = vmul.f32 0.2, %v39_v7  ;;  %163 = vmatpush3.msk.msra.mxu0 %vm63_vm1, %v57_v9  ;;  %vm44_vm5 = vcmp.ge.f32.partialorder %v39_v7, 0.0  ;;  %v55_v12 = vsel %vm45_vm4, %v40_v3, %v50_v6  ;;  %v58_v16 = vld [vmem:[#allocation5] sm:$0xff]  ;;  %s144_s1 = sshll.u32 %s254_s0, 4  ;;  %s145_s1 = int_to_ptr.vmem [resolvable:$true] %s144_s1 }
  0x21   :  { %164 = vmatprep.subr.mxu0 %v252_v0  ;;  %v48_v13 = vmul.f32 0.2, %v38_v8  ;;  %vm43_vm6 = vcmp.ge.f32.partialorder %v38_v8, 0.0  ;;  %s222_s21 = scalar_lea.vmem %s145_s1, 128  ;;  %p227_p11 = scmp.lt.s32.totalorder %s145_s1, %s145_s1 }
  0x22   :  { %165 = vmatpush3.msra.mxu0 %v56_v10  ;;  %v54_v14 = vsel %vm44_vm5, %v39_v7, %v49_v11  ;;  %p223_p10 = scmp.ne.s32.totalorder %s145_s1, %s222_s21  ;;  %p228_p12 = scmp.lt.s32.totalorder %s222_s21, %s222_s21 }
  0x23   :  { %166 = vmatprep.subr.mxu0 %v252_v0  ;;  %v53_v15 = vsel %vm43_vm6, %v38_v8, %v48_v13 }
  0x24   :  { %167 = vmatpush3.msra.mxu0 %v55_v12  ;;  %p229_p13 = por %p228_p12, %p227_p11 }
  0x25   :  { %168 = vmatprep.subr.mxu0 %v252_v0 }
  0x26   :  { %169 = vmatpush3.msra.mxu0 %v54_v14  ;;  %p230_p0 = pnand %p229_p13, %p223_p10 }
  0x27   :  { %170 = vmatprep.subr.mxu0 %v252_v0 }
  0x28   :  { %171 = vmatpush3.msra.mxu0 %v53_v15 }
  0x29   :  { %173 = vmatmul.mubr.msk.f32.vlgmr.msra.gmra.mxu0 %vm59_vm7, %v58_v16 }
  0xe9   :  { %v133_v17 = vpop.f32.mrf.mxu0 }
  0xea   :  { %137 = vst [vmem:[#allocation7] sm:$0xff] %v133_v17 }
  0xeb   :  { %v174_v18 = vpop.f32.mrf.mxu0 }
  0xec   :  { %233 = shalt.err (!%p230_p0)
}
  0xed   :  { %147 = dma.vmem_to_hbm [thread:$0]  %s145_s1, 128, %s281_s2, [#allocation4]  }
  0xee   :  { %246 = dma.done.wait [#allocation4], 128  }
  0xef   :  { %247 = vsyncadd [#allocation4], 4294967168 }
  0xf0   :  { %151 = vsyncpa [#allocation3], 1 }
  0xf1   :  { %152 = vsyncpa [#allocation6], 1 }
  0xf2   :  { %153 = vsyncpa [#allocation4], 1 }

</bundles_post_ra>
